<compile_context>
chip_gen: v7x
topology: tpu7x:2x2x1
jax: 0.10.0
libtpu: 0.0.40
codegen_flags: <defaults>
</compile_context>

<pallas_src>
import functools

import jax
import jax.numpy as jnp
from jax.experimental import pallas as pl
from jax.experimental.pallas import tpu as pltpu


_TN = 384  # C_out tile: 3 x 128 lanes -> unmasked stores, few grid steps.


def _round_up(x: int, m: int) -> int:
    return (x + m - 1) // m * m


def _conv1x1_matmul_kernel(x_ref, w_ref, o_ref):
    # x_ref: [M_pad, K_pad] bf16, w_ref: [K_pad, TN] bf16, o_ref: [M_pad, TN] f32
    o_ref[...] = jnp.dot(
        x_ref[...], w_ref[...], preferred_element_type=jnp.float32
    ).astype(o_ref.dtype)


def prepare_weight(weight_oihw: jax.Array,
                   compute_dtype=jnp.bfloat16) -> jax.Array:
    """One-time weight prep: [C_out, C_in, 1, 1] -> padded [K_pad, N_pad].

    Done once at parameter-load time so the per-call path carries no
    weight transpose / reshape / pad.
    """
    C_out, C_in = int(weight_oihw.shape[0]), int(weight_oihw.shape[1])
    K_pad = _round_up(C_in, 128)
    N_pad = _round_up(C_out, _TN)
    w_kn = jnp.transpose(weight_oihw.reshape(C_out, C_in), (1, 0))
    w_kn = w_kn.astype(compute_dtype)
    # Zero padding keeps the matmul result exact for the real rows/cols.
    w_kn = jnp.pad(w_kn, ((0, K_pad - C_in), (0, N_pad - C_out)))
    return w_kn


@functools.partial(jax.jit, static_argnames=("c_out",))
def conv2d_1x1_nhwc(x_nchw: jax.Array, w_kn_pad: jax.Array, *, c_out: int):
    """Core path. Returns the lane-dense NHWC result [B, H, W, C_out] (f32)."""
    B, C_in, H, W = x_nchw.shape
    K_pad, N_pad = w_kn_pad.shape
    M = B * H * W
    M_pad = _round_up(M, 8)

    # NCHW -> NHWC -> [M, K]; cast to the (bf16) compute dtype; zero-pad to
    # (8,128)-aligned tile sizes so every vector load/store is unmasked.
    x_mk = jnp.transpose(x_nchw, (0, 2, 3, 1)).reshape(M, C_in)
    x_mk = x_mk.astype(w_kn_pad.dtype)
    x_mk = jnp.pad(x_mk, ((0, M_pad - M), (0, K_pad - C_in)))

    grid_n = N_pad // _TN
    bytes_accessed = (
        x_mk.size * x_mk.dtype.itemsize
        + w_kn_pad.size * w_kn_pad.dtype.itemsize
        + M_pad * N_pad * 4
    )

    out_mn = pl.pallas_call(
        _conv1x1_matmul_kernel,
        out_shape=jax.ShapeDtypeStruct((M_pad, N_pad), jnp.float32),
        grid=(grid_n,),
        in_specs=[
            # Activations: tiny, resident; constant block index -> fetched once.
            pl.BlockSpec((M_pad, K_pad), lambda j: (0, 0)),
            # Weight: streamed tile-by-tile along C_out (double-buffered).
            pl.BlockSpec((K_pad, _TN), lambda j: (0, j)),
        ],
        out_specs=pl.BlockSpec((M_pad, _TN), lambda j: (0, j)),
        compiler_params=pltpu.CompilerParams(
            dimension_semantics=("parallel",),  # v7x: split tiles across 2 TCs
        ),
        cost_estimate=pl.CostEstimate(
            flops=2 * M_pad * K_pad * N_pad,
            transcendentals=0,
            bytes_accessed=bytes_accessed,
        ),
    )(x_mk, w_kn_pad)

    # Slice off the padding; keep the lane-dense NHWC layout.
    return out_mn[:M, :c_out].reshape(B, H, W, c_out)


def conv2d_1x1(x_nchw: jax.Array, w_kn_pad: jax.Array, *, c_out: int):
    """torch.nn.Conv2d-compatible wrapper: returns NCHW [B, C_out, H, W].

    Prefer conv2d_1x1_nhwc() if the consumer can read NHWC — the final NCHW
    transpose (last dim 49 < 128) is the only masked-store layout op left.
    """
    out_nhwc = conv2d_1x1_nhwc(x_nchw, w_kn_pad, c_out=c_out)
    return jnp.transpose(out_nhwc, (0, 3, 1, 2))


if __name__ == "__main__":
    key = jax.random.PRNGKey(0)
    kx, kw = jax.random.split(key)

    # Shapes implied by the module: x606 is [1, 344, 7, 7],
    # weight is [2064, 344, 1, 1] (Conv2d(344, 2064, kernel_size=1, bias=False)).
    B, C_in, H, W, C_out = 1, 344, 7, 7, 2064
    x = jax.random.normal(kx, (B, C_in, H, W), dtype=jnp.float32)
    fan_in = C_in * 1 * 1
    bound = 1.0 / (fan_in ** 0.5)
    w = jax.random.uniform(
        kw, (C_out, C_in, 1, 1), dtype=jnp.float32, minval=-bound, maxval=bound
    )

    # Parameter-load-time prep (hoisted out of the forward path).
    w_prepared = prepare_weight(w)

    y = conv2d_1x1(x, w_prepared, c_out=C_out)
    jax.block_until_ready(y)

    assert y.shape == (B, C_out, H, W), y.shape
    assert y.dtype == jnp.float32, y.dtype

    # Reference with the same bf16 inputs / f32 accumulation as the kernel.
    y_ref_bf16 = jax.lax.conv_general_dilated(
        x.astype(jnp.bfloat16), w.astype(jnp.bfloat16),
        window_strides=(1, 1), padding="VALID",
        dimension_numbers=("NCHW", "OIHW", "NCHW"),
        preferred_element_type=jnp.float32,
    )
    assert jnp.allclose(y, y_ref_bf16, atol=2e-3, rtol=2e-3), float(
        jnp.max(jnp.abs(y - y_ref_bf16))
    )

    # Sanity check vs the full-f32 conv (looser tolerance: bf16 inputs).
    y_ref_f32 = jax.lax.conv_general_dilated(
        x, w, window_strides=(1, 1), padding="VALID",
        dimension_numbers=("NCHW", "OIHW", "NCHW"),
    )
    assert jnp.allclose(y, y_ref_f32, atol=5e-2, rtol=5e-2), float(
        jnp.max(jnp.abs(y - y_ref_f32))
    )

    print("KERNEL_OK")
</pallas_src>

<mosaic_0001>
module attributes {stable_mosaic.version = 11 : i64} {
  func.func @_conv1x1_matmul_kernel(%arg0: i32, %arg1: memref<56x384xbf16, #tpu.memory_space<vmem>>, %arg2: memref<384x384xbf16, #tpu.memory_space<vmem>>, %arg3: memref<56x384xf32, #tpu.memory_space<vmem>>) attributes {dimension_semantics = [#tpu.dimension_semantics<parallel>], iteration_bounds = array<i64: 6>, scalar_prefetch = 0 : i64, scratch_operands = 0 : i64, tpu.core_type = #tpu.core_type<tc>, window_params = [{pipeline_mode = #tpu.pipeline_mode<synchronous>, transform_indices = @transform_0, window_bounds = array<i64: 56, 384>}, {transform_indices = @transform_1, window_bounds = array<i64: 384, 384>}, {transform_indices = @transform_2, window_bounds = array<i64: 56, 384>}]} {
    %c0 = arith.constant 0 : index
    %c0_0 = arith.constant 0 : index
    %0 = vector.load %arg1[%c0, %c0_0] : memref<56x384xbf16, #tpu.memory_space<vmem>>, vector<56x384xbf16>
    %c0_1 = arith.constant 0 : index
    %c0_2 = arith.constant 0 : index
    %1 = vector.load %arg2[%c0_1, %c0_2] : memref<384x384xbf16, #tpu.memory_space<vmem>>, vector<384x384xbf16>
    %cst = arith.constant dense<0.000000e+00> : vector<56x384xf32>
    %2 = tpu.matmul %0, %1, %cst {dimension_numbers = #tpu.dot_dimension_numbers<[1], [0], [0], [1], [0, 0, 1, 1], [], []>} : vector<56x384xbf16>, vector<384x384xbf16>, vector<56x384xf32> -> vector<56x384xf32>
    %c0_3 = arith.constant 0 : index
    %c0_4 = arith.constant 0 : index
    %3 = vector.load %arg3[%c0_3, %c0_4] : memref<56x384xf32, #tpu.memory_space<vmem>>, vector<56x384xf32>
    tpu.vector_store %arg3[%c0_3, %c0_4], %2 {strides = array<i32>} : memref<56x384xf32, #tpu.memory_space<vmem>>, vector<56x384xf32>,
    return
  }
  func.func @transform_0(%arg0: i32) -> (i32, i32) {
    %c0_i32 = arith.constant 0 : i32
    %c0_i32_0 = arith.constant 0 : i32
    %c0_i32_1 = arith.constant 0 : i32
    return %c0_i32, %c0_i32_0 : i32, i32
  }
  func.func @transform_1(%arg0: i32) -> (i32, i32) {
    %c0_i32 = arith.constant 0 : i32
    %c0_i32_0 = arith.constant 0 : i32
    return %c0_i32, %arg0 : i32, i32
  }
  func.func @transform_2(%arg0: i32) -> (i32, i32) {
    %c0_i32 = arith.constant 0 : i32
    %c0_i32_0 = arith.constant 0 : i32
    return %c0_i32, %arg0 : i32, i32
  }
}

</mosaic_0001>

<bundles_post_ra>
// kernel: conv2d_1x1_nhwc.1
= control target key start
LH: loop header
LB: loop body
LE: loop exit
PB: predicated region body
PF: predicated region fallthrough
CT: control target
= control target key end

     0   :  { %7 = vsyncpa [#allocation3], 0  ;;  %s1897_s0 = inlined_call_operand.vmem [shape: bf16[56,384], index: 0, kind: input, shape index: {}]   ;;  %s1898_s1 = inlined_call_operand.hbm [shape: bf16[384,2304], index: 1, kind: input, shape index: {}]   ;;  %s1899_s2 = inlined_call_operand.vmem [shape: f32[56,2304], index: 2, kind: output, shape index: {}]  }
   0x1   :  { %9 = vsyncpa [#allocation3 + $0x1], 0  ;;  %s1577_s9 = smov 0   ;;  %s1579_s10 = smov 0  }
   0x2   :  { %s1581_s11 = smov 0   ;;  %s1583_s12 = smov 0  }
   0x3 LB: > { %s1596_s13 = sadd.s32 4294967295, %s1555_s12   ;;  %s1599_s14 = sadd.s32 1, %s1555_s12   ;;  %s1555_s12 = sphi %s1583_s12, %s1907_s12   ;;  %s1551_s11 = sphi %s1581_s11, %s1906_s11   ;;  %s1547_s10 = sphi %s1579_s10, %s1905_s10   ;;  %s1543_s9 = sphi %s1577_s9, %s1904_s9  }
   0x4   : > { %s40_s15 = ssub.s32 %s1555_s12, %s1599_s14  ;;  %s43_s16 = sadd.s32 1, %s1551_s11 }
   0x5   : > { %p41_p0 = scmp.eq.s32.totalorder %s40_s15, 0  ;;  %p50_p1 = scmp.ne.s32.totalorder %s1551_s11, %s1547_s10 }
   0x6   : > { %p51_p2 = scmp.eq.s32.totalorder %s1555_s12, 0  ;;  %p56_p3 = scmp.ne.s32.totalorder %s1547_s10, %s1543_s9 }
   0x7   : > { %s1609_s17 = scalar_select %p41_p0, %s1551_s11, %s43_s16  }
   0x8   : > { %p52_p4 = por %p51_p2, %p50_p1  ;;  %p57_p5 = scmp.eq.s32.totalorder %s1596_s13, 0 }
   0x9   : > { %p80_p6 = scmp.eq.s32.totalorder %s1596_s13, 5  ;;  %p1343_p8 = scmp.lt.s32.totalorder %s1555_s12, 6 }
   0xa   : > { %p1613_p7 = por %p57_p5, %p56_p3  ;;  %s109_s20 = sand.u32 1, %s1551_s11  }
   0xb   : > { %p1618_p9 = por %p80_p6, %p50_p1  ;;  %s1334_s21 = smul.u32 576, %s109_s20 }
   0xc   : > { %s1226_s22 = smul.u32 192, %s1555_s12  ;;  %p1624_p10 = pnand %p1343_p8, %p52_p4 }
   0xd   : > { %s1901_s19 = scalar_select %p1618_p9, 1, 0 }
   0xe   : > { %s1631_s26 = scalar_lea.hbm %s1898_s1, %s1226_s22  ;;  %s113_s27 = scalar_lea.vmem [#allocation2], %s1334_s21 }
   0xf   : > { %s120_s28 = sshll.u32 %s113_s27, 4  ;;  %s1635_s29 = scalar_lea.sflag [#allocation3], %s109_s20  ;;  %s1633_s28 = int_to_ptr.vmem [resolvable:$true] %s120_s28 }
  0x10   : > { %s1491_s30 = scalar_lea.hbm %s1631_s26, 9216  ;;  %p1493_p12 = pneg %p1624_p10 }
  0x11   : > { %p1492_p11 = scmp.ne.s32.totalorder %s1631_s26, %s1491_s30  ;;  %s1496_s5 = scalar_lea.hbm %s1898_s1, 55296 }
  0x12   : > { %p1497_p1 = scmp.lt.u32.totalorder %s1631_s26, %s1898_s1  ;;  %p1498_p2 = scmp.lt.u32.totalorder %s1496_s5, %s1491_s30 }
  0x13   : > { %p1494_p13 = pnand %p1493_p12, %p1492_p11  ;;  %p1500_p4 = scmp.lt.u32.totalorder %s1491_s30, %s1631_s26 }
  0x14   : > { %p1499_p3 = por %p1498_p2, %p1497_p1 }
  0x15   : > { %p1495_p0 = pneg %p1494_p13 }
  0x16   : > { %p1501_p5 = por %p1500_p4, %p1499_p3 }
  0x18   : > { %p1502_p6 = pnand %p1501_p5, %p1495_p0 }
  0x1a   : > { %1505 = shalt.err (!%p1502_p6)
}
  0x1b   : > { %s1506_s8 = scalar_lea.vmem %s1633_s28, 9216  ;;  %s1557_s9 = smov [#allocation2]  }
  0x1c   : > { %p1507_p8 = scmp.ne.s32.totalorder %s1633_s28, %s1506_s8  ;;  %s1511_s15 = sshll.u32 %s1557_s9, 4  ;;  %s1512_s15 = int_to_ptr.vmem [resolvable:$false] %s1511_s15 }
  0x1d   : > { %s1513_s16 = scalar_lea.vmem %s1512_s15, 18432  ;;  %p1514_p9 = scmp.lt.s32.totalorder %s1633_s28, %s1512_s15 }
  0x1e   : > { %p1509_p11 = pnand %p1507_p8, %p1493_p12  ;;  %p1515_p1 = scmp.lt.s32.totalorder %s1513_s16, %s1506_s8 }
  0x20   : > { %p1510_p13 = pneg %p1509_p11  ;;  %p1516_p2 = por %p1515_p1, %p1514_p9 }
  0x22   : > { %p1517_p3 = pnand %p1516_p2, %p1510_p13 }
  0x24   : > { %1520 = shalt.err (!%p1517_p3)
}
  0x25   : > { %s1558_s20 = smov 1152   ;;  %s1559_s21 = smov 192  }
  0x26   : > { %s1560_s22 = smov 12   ;;  %p1138_p12 = scmp.ge.s32.totalorder %s1555_s12, 1 }
  0x27   : > { %1342 = dma.hbm_to_vmem [thread:$0]  (!%p1624_p10), %s1631_s26, 9216, %s1633_s28, %s1635_s29, %s1558_s20, %s1559_s21, %s1560_s22  }
  0x28   : > { %p128_p0 = scmp.lt.s32.totalorder %s1555_s12, 7 }
  0x2a   : > { %p129_p4 = pnand %p1138_p12, %p128_p0 }
  0x2b   : > { %s1666_s24 = sand.u32 (!%p129_p4), 1, %s1547_s10  }
  0x2c   : > { %132 = sbr.rel (%p129_p4) target bundleno = 376 (0x178), region = 28  ;;  %s135_s27 = scalar_lea.sflag (!%p129_p4), [#allocation3], %s1666_s24 }
  0x2d   : > { %s1335_s25 = smul.u32 (!%p129_p4), 576, %s1666_s24 }
  0x2f   : > { %s1670_s30 = scalar_lea.vmem (!%p129_p4), [#allocation2], %s1335_s25 }
  0x33   : > { %1538 = dma.done.wait (%p1613_p7), %s135_s27, 9216  }
  0x34   : > { %1540 = vsyncadd (%p1613_p7), %s135_s27, 4294958080  ;;  %v1561_v0 = vmov 0   ;;  %v1380_v1 = vld [vmem:[%s1670_s30 + $0x4] ss:$12 sps:$4 sm:$0xff]   ;;  %v1384_v3 = vld [vmem:[%s1670_s30] ss:$12 sps:$4 sm:$0xff]  }
  0x35   : > { %817 = vmatprep.mubr.bf16.mxu1 %v1561_v0  ;;  %v1382_v2 = vld [vmem:[%s1670_s30 + $0x184] ss:$12 sps:$4 sm:$0xff]   ;;  %714 = vmatprep.subr.bf16.mxu0 %v1380_v1  ;;  %v1385_v4 = vld [vmem:[%s1670_s30 + $0x180] ss:$12 sps:$4 sm:$0xff]   ;;  %v1386_v5 = vld [vmem:[%s1670_s30 + $0x1c] ss:$12 sps:$4 sm:$0xff]  }
  0x36   : > { %785 = vmatprep.subr.bf16.mxu1 %v1382_v2  ;;  %715 = vmatpush1.bf16.msra.mxu0 %v1384_v3  ;;  %v1388_v6 = vld [vmem:[%s1670_s30 + $0x19c] ss:$12 sps:$4 sm:$0xff]   ;;  %v1390_v7 = vld [vmem:[%s1670_s30 + $0x18] ss:$12 sps:$4 sm:$0xff]   ;;  %v1392_v9 = vld [vmem:[%s1670_s30 + $0x34] ss:$12 sps:$4 sm:$0xff]  }
  0x37   : > { %786 = vmatpush1.bf16.msra.mxu1 %v1385_v4  ;;  %716 = vmatprep.subr.bf16.mxu0 %v1386_v5  ;;  %v1391_v8 = vld [vmem:[%s1670_s30 + $0x198] ss:$12 sps:$4 sm:$0xff]   ;;  %v1394_v10 = vld [vmem:[%s1670_s30 + $0x1b4] ss:$12 sps:$4 sm:$0xff]   ;;  %v1396_v11 = vld [vmem:[%s1670_s30 + $0x30] ss:$12 sps:$4 sm:$0xff]  }
  0x38   : > { %787 = vmatprep.subr.bf16.mxu1 %v1388_v6  ;;  %v1397_v12 = vld [vmem:[%s1670_s30 + $0x1b0] ss:$12 sps:$4 sm:$0xff]   ;;  %v1398_v13 = vld [vmem:[%s1670_s30 + $0x4c] ss:$12 sps:$4 sm:$0xff]   ;;  %v1402_v15 = vld [vmem:[%s1670_s30 + $0x48] ss:$12 sps:$4 sm:$0xff]  }
  0x39   : > { %v1400_v14 = vld [vmem:[%s1670_s30 + $0x1cc] ss:$12 sps:$4 sm:$0xff]   ;;  %v1403_v16 = vld [vmem:[%s1670_s30 + $0x1c8] ss:$12 sps:$4 sm:$0xff]   ;;  %v1404_v17 = vld [vmem:[%s1670_s30 + $0x64] ss:$12 sps:$4 sm:$0xff]  }
  0x3a   : > { %717 = vmatpush1.bf16.msra.mxu0 %v1390_v7  ;;  %v1406_v18 = vld [vmem:[%s1670_s30 + $0x1e4] ss:$12 sps:$4 sm:$0xff]   ;;  %v1408_v19 = vld [vmem:[%s1670_s30 + $0x60] ss:$12 sps:$4 sm:$0xff]   ;;  %v1410_v21 = vld [vmem:[%s1670_s30 + $0x7c] ss:$12 sps:$4 sm:$0xff]  }
  0x3b   : > { %788 = vmatpush1.bf16.msra.mxu1 %v1391_v8  ;;  %718 = vmatprep.subr.bf16.mxu0 %v1392_v9  ;;  %v1409_v20 = vld [vmem:[%s1670_s30 + $0x1e0] ss:$12 sps:$4 sm:$0xff]   ;;  %v1412_v22 = vld [vmem:[%s1670_s30 + $0x1fc] ss:$12 sps:$4 sm:$0xff]   ;;  %v1414_v23 = vld [vmem:[%s1670_s30 + $0x78] ss:$12 sps:$4 sm:$0xff]  }
  0x3c   : > { %789 = vmatprep.subr.bf16.mxu1 %v1394_v10  ;;  %v1415_v24 = vld [vmem:[%s1670_s30 + $0x1f8] ss:$12 sps:$4 sm:$0xff]   ;;  %v1416_v25 = vld [vmem:[%s1670_s30 + $0x94] ss:$12 sps:$4 sm:$0xff]   ;;  %v1420_v27 = vld [vmem:[%s1670_s30 + $0x90] ss:$12 sps:$4 sm:$0xff]  }
  0x3d   : > { %v1418_v26 = vld [vmem:[%s1670_s30 + $0x214] ss:$12 sps:$4 sm:$0xff]   ;;  %v1421_v28 = vld [vmem:[%s1670_s30 + $0x210] ss:$12 sps:$4 sm:$0xff]   ;;  %v1422_v29 = vld [vmem:[%s1670_s30 + $0xac] ss:$12 sps:$4 sm:$0xff]  }
  0x3e   : > { %719 = vmatpush1.bf16.msra.mxu0 %v1396_v11  ;;  %v1424_v30 = vld [vmem:[%s1670_s30 + $0x22c] ss:$12 sps:$4 sm:$0xff]   ;;  %v1426_v31 = vld [vmem:[%s1670_s30 + $0xa8] ss:$12 sps:$4 sm:$0xff]   ;;  %v1428_v33 = vld [vmem:[%s1670_s30 + $0xc4] ss:$12 sps:$4 sm:$0xff]  }
  0x3f   : > { %790 = vmatpush1.bf16.msra.mxu1 %v1397_v12  ;;  %720 = vmatprep.subr.bf16.mxu0 %v1398_v13  ;;  %v1427_v32 = vld [vmem:[%s1670_s30 + $0x228] ss:$12 sps:$4 sm:$0xff]   ;;  %v1432_v36 = vld [vmem:[%s1670_s30 + $0xc0] ss:$12 sps:$4 sm:$0xff]   ;;  %v1437_v40 = vld [vmem:[%s1670_s30 + $0xd8] ss:$12 sps:$4 sm:$0xff]  }
  0x40   : > { %791 = vmatprep.subr.bf16.mxu1 %v1400_v14  ;;  %v1713_v34 = vld [vmem:[%s1897_s0 + $0x8] ss:$12 sps:$4 sm:$0xff]   ;;  %v1436_v39 = vld [vmem:[%s1670_s30 + $0xe0] ss:$12 sps:$4 sm:$0xff]   ;;  %v1442_v43 = vld [vmem:[%s1670_s30 + $0xf8] ss:$12 sps:$4 sm:$0xff]  }
  0x41   : > { %v1431_v35 = vld [vmem:[%s1670_s30 + $0xc8] ss:$12 sps:$4 sm:$0xff]   ;;  %v1438_v41 = vld [vmem:[%s1670_s30 + $0x20] ss:$12 sps:$4 sm:$0xff]   ;;  %v1443_v45 = vld [vmem:[%s1670_s30 + $0xf0] ss:$12 sps:$4 sm:$0xff]  }
  0x42   : > { %721 = vmatpush1.bf16.msra.mxu0 %v1402_v15  ;;  %v1433_v37 = vld [vmem:[%s1670_s30 + $0x8] ss:$12 sps:$4 sm:$0xff]   ;;  %v1729_v44 = vld [vmem:[%s1897_s0 + $0x20] ss:$12 sps:$4 sm:$0xff]   ;;  %v1444_v46 = vld [vmem:[%s1670_s30 + $0x38] ss:$12 sps:$4 sm:$0xff]  }
  0x43   : > { %792 = vmatpush1.bf16.msra.mxu1 %v1403_v16  ;;  %722 = vmatprep.subr.bf16.mxu0 %v1404_v17  ;;  %v1434_v38 = vld [vmem:[%s1670_s30 + $0xdc] ss:$12 sps:$4 sm:$0xff]   ;;  %v1439_v42 = vld [vmem:[%s1670_s30 + $0xf4] ss:$12 sps:$4 sm:$0xff]   ;;  %v1445_v47 = vld [vmem:[%s1670_s30 + $0x10c] ss:$12 sps:$4 sm:$0xff]  }
  0x44   : > { %793 = vmatprep.subr.bf16.mxu1 %v1406_v18  ;;  %v1447_v48 = vld [vmem:[%s1670_s30 + $0x110] ss:$12 sps:$4 sm:$0xff]   ;;  %v1448_v49 = vld [vmem:[%s1670_s30 + $0x108] ss:$12 sps:$4 sm:$0xff]   ;;  %v1742_v52 = vld [vmem:[%s1897_s0 + $0x38] ss:$12 sps:$4 sm:$0xff]  }
  0x45   : > { %v1449_v50 = vld [vmem:[%s1670_s30 + $0x50] ss:$12 sps:$4 sm:$0xff]   ;;  %v1453_v53 = vld [vmem:[%s1670_s30 + $0x128] ss:$12 sps:$4 sm:$0xff]   ;;  %v1454_v54 = vld [vmem:[%s1670_s30 + $0x120] ss:$12 sps:$4 sm:$0xff]  }
  0x46   : > { %723 = vmatpush1.bf16.msra.mxu0 %v1408_v19  ;;  %v1450_v51 = vld [vmem:[%s1670_s30 + $0x124] ss:$12 sps:$4 sm:$0xff]   ;;  %v1455_v55 = vld [vmem:[%s1670_s30 + $0x68] ss:$12 sps:$4 sm:$0xff]   ;;  %v1458_v57 = vld [vmem:[%s1670_s30 + $0x140] ss:$12 sps:$4 sm:$0xff]  }
  0x47   : > { %794 = vmatpush1.bf16.msra.mxu1 %v1409_v20  ;;  %724 = vmatprep.subr.bf16.mxu0 %v1410_v21  ;;  %v1456_v56 = vld [vmem:[%s1670_s30 + $0x13c] ss:$12 sps:$4 sm:$0xff]   ;;  %v1459_v58 = vld [vmem:[%s1670_s30 + $0x138] ss:$12 sps:$4 sm:$0xff]   ;;  %v1460_v59 = vld [vmem:[%s1670_s30 + $0x80] ss:$12 sps:$4 sm:$0xff]  }
  0x48   : > { %795 = vmatprep.subr.bf16.mxu1 %v1412_v22  ;;  %v1461_v60 = vld [vmem:[%s1670_s30 + $0x154] ss:$12 sps:$4 sm:$0xff]   ;;  %v1474_v61 = vld [vmem:[%s1897_s0 + $0x4] ss:$12 sps:$4 sm:$0xff]   ;;  %v1467_v3 = vld [vmem:[%s1670_s30 + $0x16c] ss:$12 sps:$4 sm:$0xff]  }
  0x49   : > { %v1760_v62 = vld [vmem:[%s1897_s0 + $0x50] ss:$0 sps:$4 sm:$0xff]   ;;  %v1464_v63 = vld [vmem:[%s1670_s30 + $0x158] ss:$12 sps:$4 sm:$0xff]   ;;  %746 = vmatprep.mubr.bf16.mxu0 %v1474_v61  ;;  %v1470_v5 = vld [vmem:[%s1670_s30 + $0x168] ss:$12 sps:$4 sm:$0xff]  }
  0x4a   : > { %725 = vmatpush1.bf16.msra.mxu0 %v1414_v23  ;;  %v1465_v1 = vld [vmem:[%s1670_s30 + $0x150] ss:$12 sps:$4 sm:$0xff]   ;;  %v1466_v2 = vld [vmem:[%s1670_s30 + $0x98] ss:$12 sps:$4 sm:$0xff]   ;;  %v1472_v7 = vld [vmem:[%s1897_s0] ss:$12 sps:$4 sm:$0xff]  }
  0x4b   : > { %796 = vmatpush1.bf16.msra.mxu1 %v1415_v24  ;;  %726 = vmatprep.subr.bf16.mxu0 %v1416_v25  ;;  %v1469_v4 = vld [vmem:[%s1670_s30 + $0x170] ss:$12 sps:$4 sm:$0xff]   ;;  %v1476_v8 = vld [vmem:[%s1670_s30 + $0x1a0] ss:$12 sps:$4 sm:$0xff]   ;;  %v1480_v10 = vld [vmem:[%s1670_s30 + $0x1b8] ss:$12 sps:$4 sm:$0xff]  }
  0x4c   : > { %797 = vmatprep.subr.bf16.mxu1 %v1418_v26  ;;  %v1471_v6 = vld [vmem:[%s1670_s30 + $0xb0] ss:$12 sps:$4 sm:$0xff]   ;;  %v1479_v11 = vld [vmem:[%s1897_s0 + $0x18] ss:$12 sps:$4 sm:$0xff]   ;;  %v1482_v13 = vld [vmem:[%s1897_s0 + $0x34] ss:$12 sps:$4 sm:$0xff]  }
  0x4d   : > { %v1477_v9 = vld [vmem:[%s1897_s0 + $0x1c] ss:$12 sps:$4 sm:$0xff]   ;;  %v1486_v17 = vld [vmem:[%s1670_s30 + $0x200] ss:$12 sps:$4 sm:$0xff]   ;;  %v1489_v19 = vld [vmem:[%s1670_s30 + $0x218] ss:$12 sps:$4 sm:$0xff]  }
  0x4e   : > { %727 = vmatpush1.bf16.msra.mxu0 %v1420_v27  ;;  %v1481_v12 = vld [vmem:[%s1670_s30 + $0x1d0] ss:$12 sps:$4 sm:$0xff]   ;;  %v1485_v14 = vld [vmem:[%s1670_s30 + $0x1e8] ss:$12 sps:$4 sm:$0xff]   ;;  %p1903_p7 = scmp.ne.s32.totalorder %s1901_s19, 0 }
  0x4f   : > { %798 = vmatpush1.bf16.msra.mxu1 %v1421_v28  ;;  %728 = vmatprep.subr.bf16.mxu0 %v1422_v29  ;;  %v1484_v15 = vld [vmem:[%s1897_s0 + $0x30] ss:$12 sps:$4 sm:$0xff]   ;;  %v173_v16 = vld [vmem:[%s1897_s0 + $0x48] sm:$0xff] }
  0x50   : > { %799 = vmatprep.subr.bf16.mxu1 %v1424_v30  ;;  %v1149_v18 = vcombine.high %v173_v16, %v173_v16  ;;  %v1148_v20 = vcombine.low %v173_v16, %v173_v16  ;;  %v1490_v21 = vld [vmem:[%s1670_s30 + $0x230] ss:$12 sps:$4 sm:$0xff]  }
  0x52   : > { %729 = vmatpush1.bf16.msra.mxu0 %v1426_v31 }
  0x53   : > { %800 = vmatpush1.bf16.msra.mxu1 %v1427_v32  ;;  %730 = vmatprep.subr.bf16.mxu0 %v1428_v33 }
  0x54   : > { %1228 = vmatprep.subr.bf16.mxu1 %v1431_v35 }
  0x56   : > { %818 = vmatmul.mubr.bf16.vlgmr.msra.gmra.mrb[0].mxu1 %v1713_v34  ;;  %731 = vmatpush1.bf16.msra.mxu0 %v1432_v36 }
  0x57   : > { %1229 = vmatpush3.bf16.msra.mxu1 %v1433_v37  ;;  %732 = vmatprep.subr.bf16.mxu0 %v1434_v38 }
  0x58   : > { %1230 = vmatprep.subr.bf16.mxu1 %v1436_v39  ;;  %827 = vmatprep.mubr.bf16.mxu1 %v1561_v0 }
  0x5a   : > { %733 = vmatpush1.bf16.msra.mxu0 %v1437_v40 }
  0x5b   : > { %1231 = vmatpush3.bf16.msra.mxu1 %v1438_v41  ;;  %734 = vmatprep.subr.bf16.mxu0 %v1439_v42 }
  0x5c   : > { %1232 = vmatprep.subr.bf16.mxu1 %v1442_v43 }
  0x5e   : > { %828 = vmatmul.mubr.bf16.gmra.mrb[4].mxu1 %v1729_v44  ;;  %735 = vmatpush1.bf16.msra.mxu0 %v1443_v45 }
  0x5f   : > { %1233 = vmatpush3.bf16.msra.mxu1 %v1444_v46  ;;  %736 = vmatprep.subr.bf16.mxu0 %v1445_v47 }
  0x60   : > { %1234 = vmatprep.subr.bf16.mxu1 %v1447_v48  ;;  %837 = vmatprep.mubr.bf16.mxu1 %v1561_v0 }
  0x62   : > { %737 = vmatpush1.bf16.msra.mxu0 %v1448_v49 }
  0x63   : > { %1235 = vmatpush3.bf16.msra.mxu1 %v1449_v50  ;;  %738 = vmatprep.subr.bf16.mxu0 %v1450_v51 }
  0x64   : > { %1236 = vmatprep.subr.bf16.mxu1 %v1453_v53 }
  0x66   : > { %838 = vmatmul.mubr.bf16.gmra.mrb[8].mxu1 %v1742_v52  ;;  %739 = vmatpush1.bf16.msra.mxu0 %v1454_v54 }
  0x67   : > { %1237 = vmatpush3.bf16.msra.mxu1 %v1455_v55  ;;  %740 = vmatprep.subr.bf16.mxu0 %v1456_v56 }
  0x68   : > { %1238 = vmatprep.subr.bf16.mxu1 %v1458_v57  ;;  %847 = vmatprep.mubr.bf16.mxu1 %v1561_v0  ;;  %v1475_v0 = vld [vmem:[%s1670_s30 + $0x188] ss:$12 sps:$4 sm:$0xff]   ;;  %s1336_s30 = smul.u32 168, %s1666_s24 }
  0x69   : > { %s1227_s24 = smul.u32 (%p1903_p7), 24, %s1596_s13 }
  0x6a   : > { %741 = vmatpush1.bf16.msra.mxu0 %v1459_v58  ;;  %s1806_s23 = scalar_lea.vmem [#allocation4], %s1336_s30 }
  0x6b   : > { %1239 = vmatpush3.bf16.msra.mxu1 %v1460_v59  ;;  %742 = vmatprep.subr.bf16.mxu0 %v1461_v60  ;;  %s1846_s28 = scalar_lea.vmem (%p1903_p7), %s1899_s2, %s1227_s24 }
  0x6c   : > { %1240 = vmatprep.subr.bf16.mxu1 %v1464_v63 }
  0x6e   : > { %848 = vmatmul.mubr.bf16.gmra.mrb[12].mxu1 %v1760_v62  ;;  %743 = vmatpush1.bf16.msra.mxu0 %v1465_v1 }
  0x6f   : > { %1241 = vmatpush3.bf16.msra.mxu1 %v1466_v2  ;;  %744 = vmatprep.subr.bf16.mxu0 %v1467_v3 }
  0x70   : > { %1242 = vmatprep.subr.bf16.mxu1 %v1469_v4  ;;  %888 = vmatprep.mubr.bf16.mxu1 %v1474_v61 }
  0x72   : > { %745 = vmatpush1.bf16.msra.mxu0 %v1470_v5 }
  0x73   : > { %1243 = vmatpush3.bf16.msra.mxu1 %v1471_v6  ;;  %1280 = vmatprep.subr.bf16.mxu0 %v1475_v0 }
  0x74   : > { %1304 = vmatprep.subr.bf16.mxu1 %v1475_v0 }
  0x75   : > { %747 = vmatmul.mubr.bf16.vlgmr.msra.gmra.mrb[0].mxu0 %v1472_v7 }
  0x76   : > { %889 = vmatmul.mubr.bf16.vlgmr.msra.gmra.mrb[16].mxu1 %v1472_v7  ;;  %1281 = vmatpush3.bf16.msra.mxu0 %v1475_v0 }
  0x77   : > { %1312 = vmatpush3.bf16.msra.mxu1 %v1475_v0  ;;  %1282 = vmatprep.subr.bf16.mxu0 %v1476_v8 }
  0x78   : > { %1305 = vmatprep.subr.bf16.mxu1 %v1476_v8  ;;  %756 = vmatprep.mubr.bf16.mxu0 %v1477_v9 }
  0x79   : > { %896 = vmatprep.mubr.bf16.mxu1 %v1477_v9 }
  0x7a   : > { %1283 = vmatpush3.bf16.msra.mxu0 %v1476_v8 }
  0x7b   : > { %1313 = vmatpush3.bf16.msra.mxu1 %v1476_v8  ;;  %1284 = vmatprep.subr.bf16.mxu0 %v1480_v10 }
  0x7c   : > { %1306 = vmatprep.subr.bf16.mxu1 %v1480_v10 }
  0x7d   : > { %757 = vmatmul.mubr.bf16.gmra.mrb[4].mxu0 %v1479_v11 }
  0x7e   : > { %897 = vmatmul.mubr.bf16.gmra.mrb[20].mxu1 %v1479_v11  ;;  %1285 = vmatpush3.bf16.msra.mxu0 %v1480_v10 }
  0x7f   : > { %1314 = vmatpush3.bf16.msra.mxu1 %v1480_v10  ;;  %1286 = vmatprep.subr.bf16.mxu0 %v1481_v12 }
  0x80   : > { %1307 = vmatprep.subr.bf16.mxu1 %v1481_v12  ;;  %766 = vmatprep.mubr.bf16.mxu0 %v1482_v13 }
  0x81   : > { %904 = vmatprep.mubr.bf16.mxu1 %v1482_v13 }
  0x82   : > { %1287 = vmatpush3.bf16.msra.mxu0 %v1481_v12 }
  0x83   : > { %1315 = vmatpush3.bf16.msra.mxu1 %v1481_v12  ;;  %1288 = vmatprep.subr.bf16.mxu0 %v1485_v14 }
  0x84   : > { %1308 = vmatprep.subr.bf16.mxu1 %v1485_v14 }
  0x85   : > { %767 = vmatmul.mubr.bf16.gmra.mrb[8].mxu0 %v1484_v15 }
  0x86   : > { %905 = vmatmul.mubr.bf16.gmra.mrb[24].mxu1 %v1484_v15  ;;  %1289 = vmatpush3.bf16.msra.mxu0 %v1485_v14 }
  0x87   : > { %1316 = vmatpush3.bf16.msra.mxu1 %v1485_v14  ;;  %1290 = vmatprep.subr.bf16.mxu0 %v1486_v17 }
  0x88   : > { %1309 = vmatprep.subr.bf16.mxu1 %v1486_v17  ;;  %776 = vmatprep.mubr.bf16.mxu0 %v1149_v18 }
  0x89   : > { %912 = vmatprep.mubr.bf16.mxu1 %v1149_v18 }
  0x8a   : > { %1291 = vmatpush3.bf16.msra.mxu0 %v1486_v17 }
  0x8b   : > { %1317 = vmatpush3.bf16.msra.mxu1 %v1486_v17  ;;  %1292 = vmatprep.subr.bf16.mxu0 %v1489_v19 }
  0x8c   : > { %1310 = vmatprep.subr.bf16.mxu1 %v1489_v19 }
  0x8d   : > { %777 = vmatmul.mubr.bf16.gmra.mrb[12].mxu0 %v1148_v20 }
  0x8e   : > { %913 = vmatmul.mubr.bf16.gmra.mrb[28].mxu1 %v1148_v20  ;;  %1293 = vmatpush3.bf16.msra.mxu0 %v1489_v19 }
  0x8f   : > { %1318 = vmatpush3.bf16.msra.mxu1 %v1489_v19  ;;  %1294 = vmatprep.subr.bf16.mxu0 %v1490_v21 }
  0x90   : > { %1311 = vmatprep.subr.bf16.mxu1 %v1490_v21  ;;  %1296 = vmatprep.mubr.bf16.mxu0 %v1713_v34 }
  0x91   : > { %1300 = vmatprep.mubr.bf16.mxu1 %v1742_v52 }
  0x92   : > { %1295 = vmatpush3.bf16.msra.mxu0 %v1490_v21 }
  0x93   : > { %1319 = vmatpush3.bf16.msra.mxu1 %v1490_v21 }
  0x95   : > { %1297 = vmatmul.mubr.bf16.vlgmr.msra.gmra.mrb[16].mxu0 %v1729_v44 }
  0x96   : > { %1301 = vmatmul.mubr.bf16.vlgmr.msra.gmra.mrb[32].mxu1 %v1760_v62 }
 0x129   : > { %v819_v22 = vpop.f32.mrb[0].mxu1 }
 0x12a   : > { %v821_v23 = vpop.f32.mrb[1].mxu1 }
 0x12b   : > { %v823_v24 = vpop.f32.mrb[2].mxu1 }
 0x12c   : > { %v825_v25 = vpop.f32.mrb[3].mxu1 }
 0x131   : > { %v829_v26 = vpop.f32.mrb[4].mxu1 }
 0x132   : > { %v831_v27 = vpop.f32.mrb[5].mxu1 }
 0x133   : > { %v833_v28 = vpop.f32.mrb[6].mxu1 }
 0x134   : > { %v835_v29 = vpop.f32.mrb[7].mxu1 }
 0x139   : > { %v839_v30 = vpop.f32.mrb[8].mxu1 }
 0x13a   : > { %v841_v31 = vpop.f32.mrb[9].mxu1 }
 0x13b   : > { %v843_v32 = vpop.f32.mrb[10].mxu1 }
 0x13c   : > { %v845_v33 = vpop.f32.mrb[11].mxu1 }
 0x141   : > { %v849_v34 = vpop.f32.mrb[12].mxu1 }
 0x142   : > { %v1801_v35 = vpop.f32.mrb[13].mxu1 }
 0x143   : > { %v853_v36 = vpop.f32.mrb[14].mxu1 }
 0x144   : > { %v854_v37 = vpop.f32.mrb[15].mxu1 }
 0x148   : > { %v748_v38 = vpop.f32.mrb[0].mxu0 }
 0x149   : > { %v1244_v39 = vpop.f32.mrb[16].mxu1  ;;  %v820_v40 = vadd.f32 %v819_v22, %v748_v38  ;;  %v750_v41 = vpop.f32.mrb[1].mxu0 }
 0x14a   : > { %v1245_v42 = vpop.f32.mrb[17].mxu1  ;;  %v822_v43 = vadd.f32 %v821_v23, %v750_v41  ;;  %v752_v45 = vpop.f32.mrb[2].mxu0 }
 0x14b   : > { %v1804_v44 = vadd.f32 %v1245_v42, %v1244_v39  ;;  %v1247_v46 = vpop.f32.mrb[18].mxu1  ;;  %984 = vst [vmem:[%s1806_s23] sm:$0xff] %v820_v40  ;;  %v824_v47 = vadd.f32 %v823_v24, %v752_v45  ;;  %v754_v48 = vpop.f32.mrb[3].mxu0 }
 0x14c   : > { %v1248_v49 = vpop.f32.mrb[19].mxu1  ;;  %985 = vst [vmem:[%s1806_s23 + $0x8] sm:$0xff] %v822_v43  ;;  %v826_v50 = vadd.f32 %v825_v25, %v754_v48 }
 0x14d   : > { %v1810_v51 = vadd.f32 %v1248_v49, %v1247_v46  ;;  %987 = vst [vmem:[%s1806_s23 + $0x18] sm:$0xff] %v824_v47 }
 0x14e   : > { %988 = vst [vmem:[%s1806_s23 + $0x20] sm:$0xff] %v826_v50 }
 0x150   : > { %v758_v52 = vpop.f32.mrb[4].mxu0 }
 0x151   : > { %v1250_v53 = vpop.f32.mrb[20].mxu1  ;;  %v830_v54 = vadd.f32 %v829_v26, %v758_v52  ;;  %v760_v55 = vpop.f32.mrb[5].mxu0 }
 0x152   : > { %v1251_v56 = vpop.f32.mrb[21].mxu1  ;;  %v832_v57 = vadd.f32 %v831_v27, %v760_v55  ;;  %v762_v59 = vpop.f32.mrb[6].mxu0  ;;  %v1027_v42 = vld [vmem:[%s1806_s23] sm:$0xff] (%p1903_p7) }
 0x153   : > { %v1252_v58 = vadd.f32 %v1251_v56, %v1250_v53  ;;  %v1253_v60 = vpop.f32.mrb[22].mxu1  ;;  %990 = vst [vmem:[%s1806_s23 + $0x30] sm:$0xff] %v830_v54  ;;  %v834_v61 = vadd.f32 %v833_v28, %v762_v59  ;;  %v764_v62 = vpop.f32.mrb[7].mxu0  ;;  %v1029_v43 = vld [vmem:[%s1806_s23 + $0x8] sm:$0xff] (%p1903_p7)  ;;  %1028 = vst [vmem:[%s1846_s28] sm:$0xff] (%p1903_p7), %v1027_v42 }
 0x154   : > { %v1254_v63 = vpop.f32.mrb[23].mxu1  ;;  %991 = vst [vmem:[%s1806_s23 + $0x38] sm:$0xff] %v832_v57  ;;  %v836_v1 = vadd.f32 %v835_v29, %v764_v62  ;;  %v1033_v45 = vld [vmem:[%s1806_s23 + $0x18] sm:$0xff] (%p1903_p7)  ;;  %1030 = vst [vmem:[%s1846_s28 + $0x8] sm:$0xff] (%p1903_p7), %v1029_v43 }
 0x155   : > { %v1255_v2 = vadd.f32 %v1254_v63, %v1253_v60  ;;  %993 = vst [vmem:[%s1806_s23 + $0x48] sm:$0xff] %v834_v61  ;;  %v1035_v46 = vld [vmem:[%s1806_s23 + $0x20] sm:$0xff] (%p1903_p7)  ;;  %1034 = vst [vmem:[%s1846_s28 + $0x90] sm:$0xff] (%p1903_p7), %v1033_v45 }
 0x156   : > { %994 = vst [vmem:[%s1806_s23 + $0x50] sm:$0xff] %v836_v1  ;;  %1036 = vst [vmem:[%s1846_s28 + $0x98] sm:$0xff] (%p1903_p7), %v1035_v46 }
 0x158   : > { %v768_v3 = vpop.f32.mrb[8].mxu0 }
 0x159   : > { %v1256_v4 = vpop.f32.mrb[24].mxu1  ;;  %v840_v5 = vadd.f32 %v839_v30, %v768_v3  ;;  %v770_v6 = vpop.f32.mrb[9].mxu0 }
 0x15a   : > { %v1257_v0 = vpop.f32.mrb[25].mxu1  ;;  %v842_v7 = vadd.f32 %v841_v31, %v770_v6  ;;  %v772_v9 = vpop.f32.mrb[10].mxu0  ;;  %v1039_v48 = vld [vmem:[%s1806_s23 + $0x30] sm:$0xff] (%p1903_p7) }
 0x15b   : > { %v1258_v8 = vadd.f32 %v1257_v0, %v1256_v4  ;;  %v1259_v10 = vpop.f32.mrb[26].mxu1  ;;  %996 = vst [vmem:[%s1806_s23 + $0x60] sm:$0xff] %v840_v5  ;;  %v844_v11 = vadd.f32 %v843_v32, %v772_v9  ;;  %v774_v12 = vpop.f32.mrb[11].mxu0  ;;  %v1041_v49 = vld [vmem:[%s1806_s23 + $0x38] sm:$0xff] (%p1903_p7)  ;;  %1040 = vst [vmem:[%s1846_s28 + $0x120] sm:$0xff] (%p1903_p7), %v1039_v48 }
 0x15c   : > { %v1260_v13 = vpop.f32.mrb[27].mxu1  ;;  %997 = vst [vmem:[%s1806_s23 + $0x68] sm:$0xff] %v842_v7  ;;  %v846_v14 = vadd.f32 %v845_v33, %v774_v12  ;;  %1042 = vst [vmem:[%s1846_s28 + $0x128] sm:$0xff] (%p1903_p7), %v1041_v49 }
 0x15d   : > { %v1261_v15 = vadd.f32 %v1260_v13, %v1259_v10  ;;  %999 = vst [vmem:[%s1806_s23 + $0x78] sm:$0xff] %v844_v11  ;;  %v1047_v52 = vld [vmem:[%s1806_s23 + $0x50] sm:$0xff] (%p1903_p7) }
 0x15e   : > { %1000 = vst [vmem:[%s1806_s23 + $0x80] sm:$0xff] %v846_v14  ;;  %1048 = vst [vmem:[%s1846_s28 + $0x1b8] sm:$0xff] (%p1903_p7), %v1047_v52 }
 0x160   : > { %v778_v16 = vpop.f32.mrb[12].mxu0 }
 0x161   : > { %v1262_v17 = vpop.f32.mrb[28].mxu1  ;;  %v850_v18 = vadd.f32 %v849_v34, %v778_v16  ;;  %v780_v19 = vpop.f32.mrb[13].mxu0 }
 0x162   : > { %v1263_v20 = vpop.f32.mrb[29].mxu1  ;;  %v852_v21 = vadd.f32 %v1801_v35, %v780_v19  ;;  %v782_v23 = vpop.f32.mrb[14].mxu0  ;;  %v1051_v54 = vld [vmem:[%s1806_s23 + $0x60] sm:$0xff] (%p1903_p7) }
 0x163   : > { %v1264_v22 = vadd.f32 %v1263_v20, %v1262_v17  ;;  %v1265_v24 = vpop.f32.mrb[30].mxu1  ;;  %1002 = vst [vmem:[%s1806_s23 + $0x90] sm:$0xff] %v850_v18  ;;  %v783_v25 = vpop.f32.mrb[15].mxu0  ;;  %v1053_v55 = vld [vmem:[%s1806_s23 + $0x68] sm:$0xff] (%p1903_p7)  ;;  %1052 = vst [vmem:[%s1846_s28 + $0x240] sm:$0xff] (%p1903_p7), %v1051_v54 }
 0x164   : > { %v1266_v26 = vpop.f32.mrb[31].mxu1  ;;  %1003 = vst [vmem:[%s1806_s23 + $0x98] sm:$0xff] %v852_v21  ;;  %1054 = vst [vmem:[%s1846_s28 + $0x248] sm:$0xff] (%p1903_p7), %v1053_v55  ;;  %v1057_v57 = vld [vmem:[%s1806_s23 + $0x78] sm:$0xff] (%p1903_p7) }
 0x165   : > { %1058 = vst [vmem:[%s1846_s28 + $0x2d0] sm:$0xff] (%p1903_p7), %v1057_v57 }
 0x168   : > { %v1298_v27 = vpop.f32.mrb[16].mxu0 }
 0x169   : > { %v1302_v28 = vpop.f32.mrb[32].mxu1  ;;  %v963_v29 = vadd.f32 %v1298_v27, %v1252_v58  ;;  %v954_v31 = vpop.f32.mrb[17].mxu0  ;;  %1011 = sbr.rel (!%p1903_p7) target bundleno = 376 (0x178), region = 36  ;;  %v1059_v58 = vld [vmem:[%s1806_s23 + $0x80] sm:$0xff] (%p1903_p7) }
 0x16a   : > { %v979_v30 = vadd.f32 %v1302_v28, %v1264_v22  ;;  %v970_v32 = vpop.f32.mrb[33].mxu1  ;;  %v955_v33 = vadd.f32 %v1804_v44, %v954_v31  ;;  %v1299_v35 = vpop.f32.mrb[18].mxu0  ;;  %1060 = vst [vmem:[%s1846_s28 + $0x2d8] sm:$0xff] (%p1903_p7), %v1059_v58  ;;  %v1063_v60 = vld [vmem:[%s1806_s23 + $0x90] sm:$0xff] (%p1903_p7) }
 0x16b   : > { %v971_v34 = vadd.f32 %v1258_v8, %v970_v32  ;;  %v1303_v36 = vpop.f32.mrb[34].mxu1  ;;  %992 = vst [vmem:[%s1806_s23 + $0x40] sm:$0xff] %v963_v29  ;;  %v966_v37 = vadd.f32 %v1299_v35, %v1255_v2  ;;  %v957_v38 = vpop.f32.mrb[19].mxu0  ;;  %v1065_v61 = vld [vmem:[%s1806_s23 + $0x98] sm:$0xff] (%p1903_p7)  ;;  %1064 = vst [vmem:[%s1846_s28 + $0x360] sm:$0xff] (%p1903_p7), %v1063_v60 }
 0x16c   : > { %1004 = vst [vmem:[%s1806_s23 + $0xa0] sm:$0xff] %v979_v30  ;;  %v973_v39 = vpop.f32.mrb[35].mxu1  ;;  %986 = vst [vmem:[%s1806_s23 + $0x10] sm:$0xff] %v955_v33  ;;  %v958_v40 = vadd.f32 %v1810_v51, %v957_v38  ;;  %v1045_v51 = vld [vmem:[%s1806_s23 + $0x48] sm:$0xff] (%p1903_p7) }
 0x16d   : > { %998 = vst [vmem:[%s1806_s23 + $0x70] sm:$0xff] %v971_v34  ;;  %v974_v41 = vadd.f32 %v1261_v15, %v973_v39  ;;  %995 = vst [vmem:[%s1806_s23 + $0x58] sm:$0xff] %v966_v37 }
 0x16e   : > { %989 = vst [vmem:[%s1806_s23 + $0x28] sm:$0xff] %v958_v40  ;;  %1046 = vst [vmem:[%s1846_s28 + $0x1b0] sm:$0xff] (%p1903_p7), %v1045_v51 }
 0x16f   : > { %1001 = vst [vmem:[%s1806_s23 + $0x88] sm:$0xff] %v974_v41  ;;  %1066 = vst [vmem:[%s1846_s28 + $0x368] sm:$0xff] (%p1903_p7), %v1065_v61 }
 0x172   : > { %v1043_v50 = vld [vmem:[%s1806_s23 + $0x40] sm:$0xff] }
 0x173   : > { %v1031_v44 = vld [vmem:[%s1806_s23 + $0x10] sm:$0xff]  ;;  %1044 = vst [vmem:[%s1846_s28 + $0x130] sm:$0xff] %v1043_v50  ;;  %v1067_v62 = vld [vmem:[%s1806_s23 + $0xa0] sm:$0xff] }
 0x174   : > { %1032 = vst [vmem:[%s1846_s28 + $0x10] sm:$0xff] %v1031_v44  ;;  %v1049_v53 = vld [vmem:[%s1806_s23 + $0x58] sm:$0xff]  ;;  %v1055_v56 = vld [vmem:[%s1806_s23 + $0x70] sm:$0xff]  ;;  %1068 = vst [vmem:[%s1846_s28 + $0x370] sm:$0xff] %v1067_v62 }
 0x175   : > { %v1037_v47 = vld [vmem:[%s1806_s23 + $0x28] sm:$0xff]  ;;  %1050 = vst [vmem:[%s1846_s28 + $0x1c0] sm:$0xff] %v1049_v53  ;;  %1056 = vst [vmem:[%s1846_s28 + $0x250] sm:$0xff] %v1055_v56 }
 0x176   : > { %1038 = vst [vmem:[%s1846_s28 + $0xa0] sm:$0xff] %v1037_v47  ;;  %v1061_v59 = vld [vmem:[%s1806_s23 + $0x88] sm:$0xff] }
 0x177   : > { %1062 = vst [vmem:[%s1846_s28 + $0x2e0] sm:$0xff] %v1061_v59 }
 0x178 PF: > { %p12_p9 = scmp.ge.s32.totalorder %s1599_s14, 8   ;;  %s1904_s9 = smov %s1547_s10 }
 0x179   : > { %s1905_s10 = smov %s1551_s11  ;;  %s1906_s11 = smov %s1609_s17 }
 0x17a   : > { %s1907_s12 = smov %s1599_s14  ;;  %14 = sbr.rel (!%p12_p9) target bundleno = 3 (0x3), region = 91 }
 0x181   :  { %1084 = vsyncpa [#allocation3], 1 }
 0x182   :  { %1086 = vsyncpa [#allocation3 + $0x1], 1 }

</bundles_post_ra>
